<compile_context>
chip_gen: v6e
topology: v6e:2x2x1
jax: 0.10.0
libtpu: 0.0.40
codegen_flags: <defaults>
</compile_context>

<pallas_src>
import functools

import jax
import jax.numpy as jnp
from jax import lax
from jax.experimental import pallas as pl
from jax.experimental.pallas import tpu as pltpu

CLS_HIDDEN = 512  # classifier hidden width (fixed by the module spec)


def _meth_head_kernel(seq_ref, midx_ref, maskw_ref, w1a_ref, mtab_ref, out_ref,
                      *, bt, s_len):
    """One grid step == `bt` batch items, flattened along the sublane axis.

    seq_ref  : (bt*S, H)   f32    ESM last_hidden_state block (cast to bf16 here)
    midx_ref : (bt*S, 1)   int32  methylation + 1, in {0..3}
    maskw_ref: (bt*S, 1)   f32    attention mask / per-item mask sum (mean weights)
    w1a_ref  : (H, 512)    bf16   classifier W1 rows for the sequence half
    mtab_ref : (4, 512)    f32    folded table  Wm@W1b + bm@W1b + b1
    out_ref  : (bt, 512)   f32    masked-mean-pooled hidden (pre final Linear)
    """
    rows = bt * s_len

    # --- sequence half of concat@W1 on the MXU (one big matmul, f32 acc) ----
    seq = seq_ref[...].astype(jnp.bfloat16)                      # (rows, H)
    hs = jnp.dot(seq, w1a_ref[...],
                 preferred_element_type=jnp.float32)             # (rows, 512)

    # --- methylation half collapses to a 4-way row select (VPU) -------------
    midx = midx_ref[...]                                         # (rows, 1)
    r0 = mtab_ref[0:1]
    r1 = mtab_ref[1:2]
    r2 = mtab_ref[2:3]
    r3 = mtab_ref[3:4]
    meth = jnp.where(midx == 0, r0,
           jnp.where(midx == 1, r1,
           jnp.where(midx == 2, r2, r3)))                        # (rows, 512)

    # ReLU; Dropout(0.1) is identity in eval mode; b1 already folded in mtab.
    h = jnp.maximum(hs + meth, 0.0)                              # (rows, 512)

    # --- masked mean pool on the MXU -----------------------------------------
    # maskw already contains mask/denom, so a plain block-diagonal sum == mean.
    hm = h * maskw_ref[...]                                      # (rows, 512)

    row_id = lax.broadcasted_iota(jnp.int32, (bt, rows), 0)      # batch item r
    col_id = lax.broadcasted_iota(jnp.int32, (bt, rows), 1)      # flattened pos c
    sel = jnp.logical_and(col_id >= row_id * s_len,
                          col_id < (row_id + 1) * s_len)
    ones_bd = sel.astype(jnp.float32)                            # (bt, rows)

    out_ref[...] = jnp.dot(ones_bd, hm,
                           preferred_element_type=jnp.float32)   # (bt, 512)


def methylation_head_pallas(sequence_output, methylation, attention_mask, params,
                            *, block_b=16):
    """Pallas implementation of everything after the base encoder.

    sequence_output: (B, S, H) float32 (or bf16)  — ESM last_hidden_state stand-in
    methylation:     (B, S)    int32 in {-1, 0, 1, 2}
    attention_mask:  (B, S)    int/float {0, 1}
    Returns pooled logits (B, 2).
    """
    B, S, H = sequence_output.shape
    f32 = jnp.float32

    # ---- fold the linear methylation path + b1 into a 4-row lookup table ----
    w1 = params["w1"].astype(f32)                                 # (2H, 512)
    w1a = w1[:H, :].astype(jnp.bfloat16)                          # (H, 512) MXU operand
    w1b = w1[H:, :]                                               # (H, 512) folded away
    mtab = (jnp.dot(params["wm"].astype(f32), w1b)
            + jnp.dot(params["bm"].astype(f32), w1b)[None, :]
            + params["b1"].astype(f32)[None, :])                  # (4, 512)

    # ---- small side inputs (one column each; negligible HBM traffic) --------
    midx = (methylation.astype(jnp.int32) + 1)[..., None]         # (B, S, 1)
    mask = attention_mask.astype(f32)                             # (B, S)
    denom = jnp.maximum(jnp.sum(mask, axis=1, keepdims=True), 1.0)  # 0-mask guard
    maskw = (mask / denom)[..., None]                             # (B, S, 1), rows sum to 1

    # ---- blocking: `bt` items per grid step ----------------------------------
    # bt multiple of 8 keeps the (bt, 512) output store and the (bt*S, H) seq
    # block fully (8,128)-tile aligned; bt == B handles the tiny-batch case with
    # a single full-array block.  Batch is padded only when bt does not divide B.
    # For very wide encoders (H >~ 1024) on v7x (64 MiB VMEM/TC) reduce block_b.
    bt = B if B <= block_b else max(8, (block_b // 8) * 8)
    b_pad = pl.cdiv(B, bt) * bt

    seq = sequence_output                                         # keep native dtype; cast per-tile
    if b_pad != B:
        pad = b_pad - B                                           # padded rows: mask == 0
        seq = jnp.pad(seq, ((0, pad), (0, 0), (0, 0)))
        midx = jnp.pad(midx, ((0, pad), (0, 0), (0, 0)))
        maskw = jnp.pad(maskw, ((0, pad), (0, 0), (0, 0)))

    # Flatten batch*seq (metadata-only reshape of contiguous arrays — no HBM pass).
    seq_flat = seq.reshape(b_pad * S, H)
    midx_flat = midx.reshape(b_pad * S, 1)
    maskw_flat = maskw.reshape(b_pad * S, 1)

    rows = bt * S
    const_spec = lambda shape: pl.BlockSpec(shape, lambda b: (0, 0))

    pooled = pl.pallas_call(
        functools.partial(_meth_head_kernel, bt=bt, s_len=S),
        out_shape=jax.ShapeDtypeStruct((b_pad, CLS_HIDDEN), f32),
        grid_spec=pltpu.PrefetchScalarGridSpec(
            num_scalar_prefetch=0,
            grid=(b_pad // bt,),
            in_specs=[
                pl.BlockSpec((rows, H), lambda b: (b, 0)),        # sequence_output (flat)
                pl.BlockSpec((rows, 1), lambda b: (b, 0)),        # methylation idx (flat)
                pl.BlockSpec((rows, 1), lambda b: (b, 0)),        # mean-pool weights (flat)
                const_spec((H, CLS_HIDDEN)),                      # w1a (bf16)
                const_spec((4, CLS_HIDDEN)),                      # folded meth table (+b1)
            ],
            out_specs=pl.BlockSpec((bt, CLS_HIDDEN), lambda b: (b, 0)),
        ),
        compiler_params=pltpu.CompilerParams(
            dimension_semantics=("parallel",),
            vmem_limit_bytes=48 * 1024 * 1024),
    )(seq_flat, midx_flat, maskw_flat, w1a, mtab)

    pooled = pooled[:B]                                           # (B, 512)

    # Final Linear(512, 2) on the pooled vector — tiny; kept in XLA so the
    # kernel's output stays lane-dense (512 lanes instead of 2).
    w2 = params["w2"].astype(f32)
    b2 = params["b2"].astype(f32)
    return jnp.dot(pooled, w2) + b2[None, :]                      # (B, 2)


def methylation_aware_forward(input_ids, attention_mask, methylation, params,
                              labels=None):
    """Full forward (eval mode) mirroring MethylationAwareModel.forward."""
    # TODO(synk): stand-in for base_model.esm(...)[last_hidden_state] — the
    # pretrained ESM transformer is not translated; use a deterministic
    # token-embedding lookup so the downstream Pallas head has real inputs.
    sequence_output = params["token_embed"][input_ids]            # (B, S, H) f32

    pooled_logits = methylation_head_pallas(
        sequence_output, methylation, attention_mask, params)

    if labels is not None:
        logp = jax.nn.log_softmax(pooled_logits, axis=-1)
        nll = -jnp.take_along_axis(logp, labels[:, None].astype(jnp.int32),
                                   axis=-1)[:, 0]
        loss = jnp.mean(nll)                                      # CrossEntropyLoss
        return {"loss": loss, "logits": pooled_logits}
    return {"logits": pooled_logits}


def _reference_head(sequence_output, methylation, attention_mask, params):
    """Pure-JAX f32 reference of the torch head (for correctness check)."""
    moh = jax.nn.one_hot(methylation + 1, 4, dtype=jnp.float32)
    meth_emb = jnp.einsum("bsc,ch->bsh", moh, params["wm"]) + params["bm"]
    comb = jnp.concatenate([sequence_output, meth_emb], axis=-1)
    h = jnp.maximum(jnp.einsum("bsh,hf->bsf", comb, params["w1"]) + params["b1"], 0.0)
    logits = jnp.einsum("bsf,fo->bso", h, params["w2"]) + params["b2"]
    mask = attention_mask.astype(jnp.float32)[..., None]
    return jnp.sum(logits * mask, axis=1) / jnp.sum(mask, axis=1)


def init_params(key, vocab_size, hidden_size):
    """Deterministic synthetic parameters matching the module's __init__ shapes."""
    ks = jax.random.split(key, 7)
    H = hidden_size
    return {
        # synthetic base-encoder stand-in
        "token_embed": 0.02 * jax.random.normal(ks[0], (vocab_size, H), jnp.float32),
        # methylation_embedding = nn.Linear(4, H)
        "wm": 0.1 * jax.random.normal(ks[1], (4, H), jnp.float32),
        "bm": 0.1 * jax.random.normal(ks[2], (H,), jnp.float32),
        # classifier = Linear(2H, 512) -> ReLU -> Dropout -> Linear(512, 2)
        "w1": 0.05 * jax.random.normal(ks[3], (2 * H, 512), jnp.float32),
        "b1": 0.05 * jax.random.normal(ks[4], (512,), jnp.float32),
        "w2": 0.05 * jax.random.normal(ks[5], (512, 2), jnp.float32),
        "b2": 0.05 * jax.random.normal(ks[6], (2,), jnp.float32),
    }


if __name__ == "__main__":
    B, S, H, VOCAB = 2, 8, 32, 33   # small shapes; module default seq_len=151

    key = jax.random.PRNGKey(0)
    k_ids, k_meth, k_mask, k_lab, k_par = jax.random.split(key, 5)

    input_ids = jax.random.randint(k_ids, (B, S), 0, VOCAB, dtype=jnp.int32)
    methylation = jax.random.randint(k_meth, (B, S), -1, 3, dtype=jnp.int32)  # {-1..2}
    attention_mask = (jax.random.uniform(k_mask, (B, S)) > 0.2).astype(jnp.int32)
    attention_mask = attention_mask.at[:, 0].set(1)   # avoid all-zero mask rows
    labels = jax.random.randint(k_lab, (B,), 0, 2, dtype=jnp.int32)

    params = init_params(k_par, VOCAB, H)

    out = methylation_aware_forward(input_ids, attention_mask, methylation,
                                    params, labels=labels)
    jax.block_until_ready(out["logits"])
    jax.block_until_ready(out["loss"])

    assert out["logits"].shape == (B, 2)
    assert out["loss"].shape == ()
    assert bool(jnp.isfinite(out["loss"]))

    # Correctness check against a pure-JAX f32 reference (bf16 matmul tolerance).
    seq_out = params["token_embed"][input_ids]
    ref_logits = _reference_head(seq_out, methylation, attention_mask, params)
    assert jnp.allclose(out["logits"], ref_logits, rtol=5e-2, atol=5e-2), (
        out["logits"], ref_logits)

    print("KERNEL_OK")
</pallas_src>

<mosaic_0001>
module attributes {stable_mosaic.version = 11 : i64} {
  func.func @_meth_head_kernel(%arg0: i32, %arg1: memref<16x32xf32, #tpu.memory_space<vmem>>, %arg2: memref<16x1xi32, #tpu.memory_space<vmem>>, %arg3: memref<16x1xf32, #tpu.memory_space<vmem>>, %arg4: memref<32x512xbf16, #tpu.memory_space<vmem>>, %arg5: memref<4x512xf32, #tpu.memory_space<vmem>>, %arg6: memref<2x512xf32, #tpu.memory_space<vmem>>) attributes {dimension_semantics = [#tpu.dimension_semantics<parallel>], iteration_bounds = array<i64: 1>, scalar_prefetch = 0 : i64, scratch_operands = 0 : i64, tpu.core_type = #tpu.core_type<tc>, window_params = [{transform_indices = @transform_0, window_bounds = array<i64: 16, 32>}, {transform_indices = @transform_1, window_bounds = array<i64: 16, 1>}, {transform_indices = @transform_2, window_bounds = array<i64: 16, 1>}, {pipeline_mode = #tpu.pipeline_mode<synchronous>, transform_indices = @transform_3, window_bounds = array<i64: 32, 512>}, {pipeline_mode = #tpu.pipeline_mode<synchronous>, transform_indices = @transform_4, window_bounds = array<i64: 4, 512>}, {transform_indices = @transform_5, window_bounds = array<i64: 2, 512>}]} {
    %c0 = arith.constant 0 : index
    %c0_0 = arith.constant 0 : index
    %0 = vector.load %arg1[%c0, %c0_0] : memref<16x32xf32, #tpu.memory_space<vmem>>, vector<16x32xf32>
    %1 = arith.truncf %0 : vector<16x32xf32> to vector<16x32xbf16>
    %c0_1 = arith.constant 0 : index
    %c0_2 = arith.constant 0 : index
    %2 = vector.load %arg4[%c0_1, %c0_2] : memref<32x512xbf16, #tpu.memory_space<vmem>>, vector<32x512xbf16>
    %cst = arith.constant dense<0.000000e+00> : vector<16x512xf32>
    %3 = tpu.matmul %1, %2, %cst {dimension_numbers = #tpu.dot_dimension_numbers<[1], [0], [0], [1], [0, 0, 1, 1], [], []>} : vector<16x32xbf16>, vector<32x512xbf16>, vector<16x512xf32> -> vector<16x512xf32>
    %c0_3 = arith.constant 0 : index
    %c0_4 = arith.constant 0 : index
    %4 = vector.load %arg2[%c0_3, %c0_4] : memref<16x1xi32, #tpu.memory_space<vmem>>, vector<16x1xi32>
    %c0_5 = arith.constant 0 : index
    %c0_6 = arith.constant 0 : index
    %5 = vector.load %arg5[%c0_5, %c0_6] : memref<4x512xf32, #tpu.memory_space<vmem>>, vector<1x512xf32>
    %c1 = arith.constant 1 : index
    %c0_7 = arith.constant 0 : index
    %6 = vector.load %arg5[%c1, %c0_7] : memref<4x512xf32, #tpu.memory_space<vmem>>, vector<1x512xf32>
    %c2 = arith.constant 2 : index
    %c0_8 = arith.constant 0 : index
    %7 = vector.load %arg5[%c2, %c0_8] : memref<4x512xf32, #tpu.memory_space<vmem>>, vector<1x512xf32>
    %c3 = arith.constant 3 : index
    %c0_9 = arith.constant 0 : index
    %8 = vector.load %arg5[%c3, %c0_9] : memref<4x512xf32, #tpu.memory_space<vmem>>, vector<1x512xf32>
    %c0_i32 = arith.constant 0 : i32
    %9 = vector.broadcast %c0_i32 : i32 to vector<16x1xi32>
    %10 = arith.cmpi eq, %4, %9 : vector<16x1xi32>
    %c1_i32 = arith.constant 1 : i32
    %11 = vector.broadcast %c1_i32 : i32 to vector<16x1xi32>
    %12 = arith.cmpi eq, %4, %11 : vector<16x1xi32>
    %c2_i32 = arith.constant 2 : i32
    %13 = vector.broadcast %c2_i32 : i32 to vector<16x1xi32>
    %14 = arith.cmpi eq, %4, %13 : vector<16x1xi32>
    %15 = vector.shape_cast %14 : vector<16x1xi1> to vector<16x1xi1>
    %16 = vector.broadcast %15 : vector<16x1xi1> to vector<16x512xi1>
    %17 = vector.shape_cast %7 : vector<1x512xf32> to vector<1x512xf32>
    %18 = vector.broadcast %17 : vector<1x512xf32> to vector<16x512xf32>
    %19 = vector.shape_cast %8 : vector<1x512xf32> to vector<1x512xf32>
    %20 = vector.broadcast %19 : vector<1x512xf32> to vector<16x512xf32>
    %21 = arith.select %16, %18, %20 : vector<16x512xi1>, vector<16x512xf32>
    %22 = vector.shape_cast %12 : vector<16x1xi1> to vector<16x1xi1>
    %23 = vector.broadcast %22 : vector<16x1xi1> to vector<16x512xi1>
    %24 = vector.shape_cast %6 : vector<1x512xf32> to vector<1x512xf32>
    %25 = vector.broadcast %24 : vector<1x512xf32> to vector<16x512xf32>
    %26 = arith.select %23, %25, %21 : vector<16x512xi1>, vector<16x512xf32>
    %27 = vector.shape_cast %10 : vector<16x1xi1> to vector<16x1xi1>
    %28 = vector.broadcast %27 : vector<16x1xi1> to vector<16x512xi1>
    %29 = vector.shape_cast %5 : vector<1x512xf32> to vector<1x512xf32>
    %30 = vector.broadcast %29 : vector<1x512xf32> to vector<16x512xf32>
    %31 = arith.select %28, %30, %26 : vector<16x512xi1>, vector<16x512xf32>
    %32 = arith.addf %3, %31 : vector<16x512xf32>
    %cst_10 = arith.constant 0.000000e+00 : f32
    %33 = vector.broadcast %cst_10 : f32 to vector<16x512xf32>
    %34 = arith.maximumf %32, %33 : vector<16x512xf32>
    %c0_11 = arith.constant 0 : index
    %c0_12 = arith.constant 0 : index
    %35 = vector.load %arg3[%c0_11, %c0_12] : memref<16x1xf32, #tpu.memory_space<vmem>>, vector<16x1xf32>
    %36 = vector.broadcast %35 : vector<16x1xf32> to vector<16x512xf32>
    %37 = arith.mulf %34, %36 : vector<16x512xf32>
    %38 = tpu.iota {dimensions = array<i32: 0>} : vector<2x16xi32>
    %39 = tpu.iota {dimensions = array<i32: 1>} : vector<2x16xi32>
    %c8_i32 = arith.constant 8 : i32
    %40 = vector.broadcast %c8_i32 : i32 to vector<2x16xi32>
    %41 = arith.muli %38, %40 : vector<2x16xi32>
    %42 = arith.cmpi sge, %39, %41 : vector<2x16xi32>
    %c1_i32_13 = arith.constant 1 : i32
    %43 = vector.broadcast %c1_i32_13 : i32 to vector<2x16xi32>
    %44 = arith.addi %38, %43 : vector<2x16xi32>
    %c8_i32_14 = arith.constant 8 : i32
    %45 = vector.broadcast %c8_i32_14 : i32 to vector<2x16xi32>
    %46 = arith.muli %44, %45 : vector<2x16xi32>
    %47 = arith.cmpi slt, %39, %46 : vector<2x16xi32>
    %48 = arith.andi %42, %47 : vector<2x16xi1>
    %49 = arith.extui %48 : vector<2x16xi1> to vector<2x16xi32>
    %50 = arith.sitofp %49 : vector<2x16xi32> to vector<2x16xf32>
    %cst_15 = arith.constant dense<0.000000e+00> : vector<2x512xf32>
    %51 = tpu.matmul %50, %37, %cst_15 {dimension_numbers = #tpu.dot_dimension_numbers<[1], [0], [0], [1], [0, 0, 1, 1], [], []>} : vector<2x16xf32>, vector<16x512xf32>, vector<2x512xf32> -> vector<2x512xf32>
    %c0_16 = arith.constant 0 : index
    %c0_17 = arith.constant 0 : index
    %52 = vector.load %arg6[%c0_16, %c0_17] : memref<2x512xf32, #tpu.memory_space<vmem>>, vector<2x512xf32>
    tpu.vector_store %arg6[%c0_16, %c0_17], %51 {strides = array<i32>} : memref<2x512xf32, #tpu.memory_space<vmem>>, vector<2x512xf32>,
    return
  }
  func.func @transform_0(%arg0: i32) -> (i32, i32) {
    %c0_i32 = arith.constant 0 : i32
    %c0_i32_0 = arith.constant 0 : i32
    return %arg0, %c0_i32 : i32, i32
  }
  func.func @transform_1(%arg0: i32) -> (i32, i32) {
    %c0_i32 = arith.constant 0 : i32
    %c0_i32_0 = arith.constant 0 : i32
    return %arg0, %c0_i32 : i32, i32
  }
  func.func @transform_2(%arg0: i32) -> (i32, i32) {
    %c0_i32 = arith.constant 0 : i32
    %c0_i32_0 = arith.constant 0 : i32
    return %arg0, %c0_i32 : i32, i32
  }
  func.func @transform_3(%arg0: i32) -> (i32, i32) {
    %c0_i32 = arith.constant 0 : i32
    %c0_i32_0 = arith.constant 0 : i32
    %c0_i32_1 = arith.constant 0 : i32
    return %c0_i32, %c0_i32_0 : i32, i32
  }
  func.func @transform_4(%arg0: i32) -> (i32, i32) {
    %c0_i32 = arith.constant 0 : i32
    %c0_i32_0 = arith.constant 0 : i32
    %c0_i32_1 = arith.constant 0 : i32
    return %c0_i32, %c0_i32_0 : i32, i32
  }
  func.func @transform_5(%arg0: i32) -> (i32, i32) {
    %c0_i32 = arith.constant 0 : i32
    %c0_i32_0 = arith.constant 0 : i32
    return %arg0, %c0_i32 : i32, i32
  }
}

</mosaic_0001>

<bundles_post_ra>
// kernel: tpu_custom_call.1
= control target key start
LH: loop header
LB: loop body
LE: loop exit
PB: predicated region body
PF: predicated region fallthrough
CT: control target
= control target key end

     0   :  { %10 = vsyncpa [#allocation3], 0  ;;  %s752_s0 = inlined_call_operand.vmem [shape: f32[16,32], index: 0, kind: input, shape index: {}]   ;;  %s753_s1 = inlined_call_operand.vmem [shape: s32[16,1], index: 1, kind: input, shape index: {}]   ;;  %s754_s2 = inlined_call_operand.vmem [shape: f32[16,1], index: 2, kind: input, shape index: {}]   ;;  %s755_s3 = inlined_call_operand.hbm [shape: bf16[32,512], index: 3, kind: input, shape index: {}]   ;;  %s756_s4 = inlined_call_operand.vmem [shape: f32[4,512], index: 4, kind: input, shape index: {}]   ;;  %s757_s5 = inlined_call_operand.hbm [shape: f32[2,512], index: 5, kind: output, shape index: {}]  }
   0x1   :  { %11 = vsyncpa [#allocation4], 0  ;;  %s635_s18 = smov [#allocation2]  }
   0x2   :  { %s23_s19 = sshll.u32 %s635_s18, 4  ;;  %s24_s19 = int_to_ptr.vmem [resolvable:$true] %s23_s19 }
   0x3   :  { %s599_s20 = scalar_lea.vmem %s24_s19, 1024  ;;  %p604_p1 = scmp.lt.s32.totalorder %s24_s19, %s24_s19 }
   0x4   :  { %p600_p0 = scmp.ne.s32.totalorder %s24_s19, %s599_s20  ;;  %p605_p2 = scmp.lt.s32.totalorder %s599_s20, %s599_s20 }
   0x6   :  { %p606_p3 = por %p605_p2, %p604_p1 }
   0x8   :  { %p607_p4 = pnand %p606_p3, %p600_p0 }
   0xa   :  { %610 = shalt.err (!%p607_p4)
}
   0xb   :  { %s636_s21 = smov 256   ;;  %s637_s22 = smov 16  }
   0xc   :  { %29 = dma.hbm_to_vmem [thread:$0]  %s755_s3, 1024, %s24_s19, [#allocation3], %s636_s21, %s636_s21, %s637_s22  }
   0xd   :  { %631 = dma.done.wait [#allocation3], 1024  }
   0xe   :  { %632 = vsyncadd [#allocation3], 4294966272  ;;  %v638_v0 = vmov 0   ;;  %v579_v1 = vld [vmem:[#allocation2 + $0x24] ss:$16 sps:$4 sm:$0xff]   ;;  %v37_v10 = vld [vmem:[%s752_s0 + $0x8] sm:$0xff]  ;;  %v73_v23 = vlaneseq }
   0xf   :  { %276 = vmatprep.mubr.bf16.mxu0 %v638_v0  ;;  %319 = vmatprep.mubr.bf16.mxu1 %v638_v0  ;;  %v581_v2 = vld [vmem:[#allocation2 + $0x2c] ss:$16 sps:$4 sm:$0xff]   ;;  %v583_v3 = vld [vmem:[#allocation2 + $0x20] ss:$16 sps:$4 sm:$0xff]   ;;  %v584_v4 = vld [vmem:[#allocation2 + $0x28] ss:$16 sps:$4 sm:$0xff]  }
  0x10   :  { %577 = vset.pattern.permute.xlu0 %v638_v0  ;;  %578 = vset.pattern.permute.xlu1 %v638_v0  ;;  %v585_v5 = vld [vmem:[#allocation2 + $0x4] ss:$16 sps:$4 sm:$0xff]   ;;  %v587_v6 = vld [vmem:[#allocation2 + $0xc] ss:$16 sps:$4 sm:$0xff]   ;;  %v589_v7 = vld [vmem:[#allocation2] ss:$16 sps:$4 sm:$0xff]  }
  0x11   :  { %256 = vmatprep.subr.bf16.mxu0 %v579_v1  ;;  %299 = vmatprep.subr.bf16.mxu1 %v581_v2  ;;  %v590_v8 = vld [vmem:[#allocation2 + $0x8] ss:$16 sps:$4 sm:$0xff]   ;;  %v36_v9 = vld [vmem:[%s752_s0] sm:$0xff]  ;;  %vm240_vm4 = vcmask 261120   ;;  %v639_v22 = vmov 0.0   ;;  %v695_v24 = vshrl.u32 %v73_v23, 7 }
  0x12   :  { %257 = vmatpush1.bf16.msra.mxu0 %v583_v3  ;;  %300 = vmatpush1.bf16.msra.mxu1 %v584_v4  ;;  %v38_v11 = vpack.c.bf16 %v37_v10, %v36_v9  ;;  %v48_v12 = vld [vmem:[%s753_s1 + $0x8] sm:$0xff]  ;;  %v47_v13 = vld [vmem:[%s753_s1] sm:$0xff] }
  0x13   :  { %258 = vmatprep.subr.bf16.mxu0 %v585_v5  ;;  %301 = vmatprep.subr.bf16.mxu1 %v587_v6  ;;  %vm61_vm0 = vcmp.eq.s32.totalorder %v48_v12, 2  ;;  %vm60_vm1 = vcmp.eq.s32.totalorder %v47_v13, 2  ;;  %vm59_vm2 = vcmp.eq.s32.totalorder %v48_v12, 1  ;;  %vm57_vm3 = vcmp.eq.s32.totalorder %v48_v12, 0  ;;  %v339_v20 = vld [vmem:[%s754_s2 + $0x8] sm:$0xff]  ;;  %v338_v21 = vld [vmem:[%s754_s2] sm:$0xff] }
  0x14   :  { %v63_v14 = vsel %vm61_vm0, 1, %v638_v0  ;;  %v62_v15 = vsel %vm60_vm1, 1, %v638_v0  ;;  %v123_v16 = vsel %vm59_vm2, 1, %v638_v0  ;;  %v162_v17 = vsel %vm57_vm3, 1, %v638_v0 }
  0x15   :  { %68 = vperm.xlu0 %577, %v63_v14   ;;  %65 = vperm.xlu1 %578, %v62_v15   ;;  %vm58_vm5 = vcmp.eq.s32.totalorder %v47_v13, 1  ;;  %vm56_vm6 = vcmp.eq.s32.totalorder %v47_v13, 0  ;;  %v75_v27 = vsub.s32 0, %v695_v24  ;;  %v79_v28 = vsub.s32 1, %v695_v24 }
  0x16   :  { %259 = vmatpush1.bf16.msra.mxu0 %v589_v7  ;;  %302 = vmatpush1.bf16.msra.mxu1 %v590_v8  ;;  %v122_v18 = vsel %vm58_vm5, 1, %v638_v0  ;;  %v161_v19 = vsel %vm56_vm6, 1, %v638_v0  ;;  %v555_v29 = vld [vmem:[%s756_s4 + $0x2] ss:$4 sm:$0xf]  ;;  %v83_v30 = vsub.s32 2, %v695_v24 }
  0x17   :  { %v87_v31 = vsub.s32 3, %v695_v24  ;;  %v556_v32 = vld [vmem:[%s756_s4 + $0x3] ss:$4 sm:$0xf]  ;;  %v76_v34 = vrot.slane %v555_v29, %v75_v27  ;;  %v80_v35 = vrot.slane %v555_v29, %v79_v28  ;;  %v364_v63 = vadd.s32 1, %v695_v24 }
  0x18   :  { %v49_v36 = vld [vmem:[%s756_s4] ss:$4 sm:$0xf]  ;;  %v554_v37 = vld [vmem:[%s756_s4 + $0x1] ss:$4 sm:$0xf]  ;;  %v84_v38 = vrot.slane %v555_v29, %v83_v30  ;;  %v97_v40 = vrot.slane %v556_v32, %v75_v27  ;;  %v105_v41 = vrot.slane %v556_v32, %v83_v30  ;;  %v101_v43 = vrot.slane %v556_v32, %v79_v28 }
  0x19   :  { %565 = vmatmul.mubr.msk.bf16.vlgmr.msra.gmra.mxu0 %vm240_vm4, %v38_v11  ;;  %566 = vmatmul.mubr.msk.bf16.vlgmr.msra.gmra.mxu1 %vm240_vm4, %v38_v11  ;;  %v88_v39 = vrot.slane %v555_v29, %v87_v31  ;;  %v109_v44 = vrot.slane %v556_v32, %v87_v31  ;;  %v136_v45 = vrot.slane %v554_v37, %v75_v27  ;;  %v361_v12 = vand.u32 127, %v73_v23  ;;  %s641_s4 = smov [#allocation5]  }
  0x1a   :  { %128 = vperm.xlu0 %577, %v123_v16   ;;  %167 = vperm.xlu1 %578, %v162_v17   ;;  %v175_v46 = vrot.slane %v49_v36, %v75_v27  ;;  %v144_v47 = vrot.slane %v554_v37, %v83_v30  ;;  %v183_v49 = vrot.slane %v49_v36, %v83_v30  ;;  %v362_v15 = vmul.u32 8, %v695_v24  ;;  %s545_s16 = sshll.u32 %s641_s4, 4  ;;  %s546_s16 = int_to_ptr.vmem [resolvable:$true] %s545_s16 }
  0x1b   :  { %438 = vmatprep.mubr.f32.mxu0 %v639_v22  ;;  %509 = vmatprep.mubr.f32.mxu1 %v639_v22  ;;  %v140_v50 = vrot.slane %v554_v37, %v79_v28  ;;  %v179_v51 = vrot.slane %v49_v36, %v79_v28  ;;  %v148_v52 = vrot.slane %v554_v37, %v87_v31  ;;  %v365_v16 = vmul.u32 8, %v364_v63  ;;  %s611_s17 = scalar_lea.vmem %s546_s16, 128  ;;  %p616_p6 = scmp.lt.s32.totalorder %s546_s16, %s546_s16 }
  0x1c   :  { %v187_v62 = vrot.slane %v49_v36, %v87_v31  ;;  %vm735_vm13 = vcmp.ge.s32.totalorder %v361_v12, %v362_v15  ;;  %vm370_vm0 = vcmask 130048   ;;  %p612_p5 = scmp.ne.s32.totalorder %s546_s16, %s611_s17  ;;  %p617_p7 = scmp.lt.s32.totalorder %s611_s17, %s611_s17 }
  0x1d   :  { %vm739_vm14 = vcmp.lt.s32.totalorder %v361_v12, %v365_v16 }
  0x1e   :  { %125 = vperm.xlu0 %577, %v122_v18   ;;  %164 = vperm.xlu1 %578, %v161_v19   ;;  %vm367_vm15 = vmand %vm735_vm13, %vm739_vm14  ;;  %p618_p8 = por %p617_p7, %p616_p6 }
  0x20   :  { %p619_p9 = pnand %p618_p8, %p612_p5 }
  0x22   :  { %347 = vperm.xlu0 %577, %v339_v20   ;;  %342 = vperm.xlu1 %578, %v338_v21  }
  0x90   :  { %v69_v25 = vpop.permute.xlu0 %68  ;;  %v66_v26 = vpop.permute.xlu1 %65 }
  0x91   :  { %vm71_vm7 = vcmp.eq.s32.totalorder %v69_v25, 1  ;;  %vm70_vm8 = vcmp.eq.s32.totalorder %v66_v26, 1 }
  0x92   :  { %v118_v53 = vsel %vm71_vm7, %v76_v34, %v97_v40  ;;  %v114_v54 = vsel %vm70_vm8, %v76_v34, %v97_v40  ;;  %v116_v55 = vsel %vm70_vm8, %v84_v38, %v105_v41  ;;  %v120_v56 = vsel %vm71_vm7, %v84_v38, %v105_v41 }
  0x93   :  { %v115_v57 = vsel %vm70_vm8, %v80_v35, %v101_v43  ;;  %v117_v58 = vsel %vm70_vm8, %v88_v39, %v109_v44  ;;  %v119_v59 = vsel %vm71_vm7, %v80_v35, %v101_v43  ;;  %v121_v60 = vsel %vm71_vm7, %v88_v39, %v109_v44 }
  0x95   :  { %v129_v33 = vpop.permute.xlu0 %128  ;;  %v168_v42 = vpop.permute.xlu1 %167 }
  0x96   :  { %vm131_vm10 = vcmp.eq.s32.totalorder %v129_v33, 1  ;;  %vm170_vm11 = vcmp.eq.s32.totalorder %v168_v42, 1 }
  0x97   :  { %v157_v6 = vsel %vm131_vm10, %v136_v45, %v118_v53  ;;  %v159_v7 = vsel %vm131_vm10, %v144_v47, %v120_v56  ;;  %v158_v10 = vsel %vm131_vm10, %v140_v50, %v119_v59  ;;  %v160_v11 = vsel %vm131_vm10, %v148_v52, %v121_v60 }
  0x98   :  { %v196_v19 = vsel %vm170_vm11, %v175_v46, %v157_v6  ;;  %v198_v21 = vsel %vm170_vm11, %v183_v49, %v159_v7  ;;  %v197_v23 = vsel %vm170_vm11, %v179_v51, %v158_v10  ;;  %v199_v28 = vsel %vm170_vm11, %v187_v62, %v160_v11 }
  0x99   :  { %v126_v48 = vpop.permute.xlu0 %125  ;;  %v165_v61 = vpop.permute.xlu1 %164 }
  0x9a   :  { %vm130_vm9 = vcmp.eq.s32.totalorder %v126_v48, 1  ;;  %vm169_vm12 = vcmp.eq.s32.totalorder %v165_v61, 1 }
  0x9b   :  { %v153_v0 = vsel %vm130_vm9, %v136_v45, %v114_v54  ;;  %v155_v2 = vsel %vm130_vm9, %v144_v47, %v116_v55  ;;  %v154_v4 = vsel %vm130_vm9, %v140_v50, %v115_v57  ;;  %v156_v5 = vsel %vm130_vm9, %v148_v52, %v117_v58 }
  0x9c   :  { %v192_v13 = vsel %vm169_vm12, %v175_v46, %v153_v0  ;;  %v194_v14 = vsel %vm169_vm12, %v183_v49, %v155_v2  ;;  %v193_v17 = vsel %vm169_vm12, %v179_v51, %v154_v4  ;;  %v195_v18 = vsel %vm169_vm12, %v187_v62, %v156_v5 }
  0x9d   :  { %v348_v45 = vpop.permute.xlu0 %347  ;;  %v343_v50 = vpop.permute.xlu1 %342  ;;  %v567_v57 = vsel %vm367_vm15, 1.0, %v639_v22  ;;  %v640_v58 = vmov 1983009808  }
  0x9e   :  { %v523_v59 = vunpack.c.l.s4 %v640_v58 }
  0xa0   :  { %v524_v60 = vunpack.c.0.s8 %v523_v59 }
  0xa2   :  { %v527_v63 = vsub.s32 %v524_v60, %v695_v24 }
  0xd9   :  { %v278_v1 = vpop.f32.mrf.mxu0  ;;  %v321_v3 = vpop.f32.mrf.mxu1 }
  0xda   :  { %v279_v29 = vadd.f32 %v278_v1, %v192_v13  ;;  %v322_v30 = vadd.f32 %v321_v3, %v194_v14 }
  0xdb   :  { %v280_v8 = vpop.f32.mrf.mxu0  ;;  %v323_v9 = vpop.f32.mrf.mxu1 }
  0xdc   :  { %v281_v26 = vadd.f32 %v280_v8, %v193_v17  ;;  %v324_v27 = vadd.f32 %v323_v9, %v195_v18  ;;  %v330_v46 = vmax.f32 %v279_v29, 0.0  ;;  %v332_v47 = vmax.f32 %v322_v30, 0.0 }
  0xdd   :  { %v282_v20 = vpop.f32.mrf.mxu0  ;;  %v325_v25 = vpop.f32.mrf.mxu1 }
  0xde   :  { %v283_v31 = vadd.f32 %v282_v20, %v196_v19  ;;  %v326_v32 = vadd.f32 %v325_v25, %v198_v21  ;;  %v331_v41 = vmax.f32 %v281_v26, 0.0  ;;  %v333_v42 = vmax.f32 %v324_v27, 0.0 }
  0xdf   :  { %v284_v33 = vpop.f32.mrf.mxu0  ;;  %v327_v34 = vpop.f32.mrf.mxu1  ;;  %v350_v55 = vmul.f32 %v343_v50, %v330_v46  ;;  %v352_v56 = vmul.f32 %v343_v50, %v332_v47 }
  0xe0   :  { %v285_v35 = vadd.f32 %v284_v33, %v197_v23  ;;  %v328_v36 = vadd.f32 %v327_v34, %v199_v28  ;;  %v334_v37 = vmax.f32 %v283_v31, 0.0  ;;  %v336_v38 = vmax.f32 %v326_v32, 0.0 }
  0xe1   :  { %v351_v53 = vmul.f32 %v343_v50, %v331_v41  ;;  %v353_v54 = vmul.f32 %v343_v50, %v333_v42 }
  0xe2   :  { %v335_v43 = vmax.f32 %v285_v35, 0.0  ;;  %v337_v44 = vmax.f32 %v328_v36, 0.0  ;;  %v354_v51 = vmul.f32 %v348_v45, %v334_v37  ;;  %v356_v52 = vmul.f32 %v348_v45, %v336_v38 }
  0xe4   :  { %v355_v48 = vmul.f32 %v348_v45, %v335_v43  ;;  %v357_v49 = vmul.f32 %v348_v45, %v337_v44 }
  0xe6   :  { %402 = vmatprep.subr.mxu0 %v355_v48  ;;  %473 = vmatprep.subr.mxu1 %v357_v49 }
  0xe7   :  { %403 = vmatpush1.msra.mxu0 %v354_v51  ;;  %474 = vmatpush1.msra.mxu1 %v356_v52 }
  0xe8   :  { %404 = vmatprep.subr.mxu0 %v351_v53  ;;  %475 = vmatprep.subr.mxu1 %v353_v54 }
  0xe9   :  { %405 = vmatpush1.msra.mxu0 %v350_v55  ;;  %476 = vmatpush1.msra.mxu1 %v352_v56 }
  0xea   :  { %568 = vmatmul.mubr.msk.f32.vlgmr.msra.gmra.mxu0 %vm370_vm0, %v567_v57  ;;  %569 = vmatmul.mubr.msk.f32.vlgmr.msra.gmra.mxu1 %vm370_vm0, %v567_v57 }
 0x1aa   :  { %v440_v61 = vpop.f32.mrf.mxu0  ;;  %v511_v62 = vpop.f32.mrf.mxu1 }
 0x1ac   :  { %v442_v0 = vpop.f32.mrf.mxu0  ;;  %v513_v1 = vpop.f32.mrf.mxu1 }
 0x1ad   :  { %v520_v2 = vcombine.low %v440_v61, %v442_v0  ;;  %v521_v3 = vcombine.low %v511_v62, %v513_v1 }
 0x1af   :  { %v528_v22 = vrot.slane %v520_v2, %v527_v63  ;;  %v535_v4 = vrot.slane %v521_v3, %v527_v63 }
 0x1b1   :  { %v536_v5 = vcombine.low %v528_v22, %v535_v4 }
 0x1b3   :  { %538 = vst [vmem:[#allocation5] sm:$0xff] %v536_v5 }
 0x1b4   :  { %622 = shalt.err (!%p619_p9)
}
 0x1b5   :  { %548 = dma.vmem_to_hbm [thread:$0]  %s546_s16, 128, %s757_s5, [#allocation4]  }
 0x1b6   :  { %633 = dma.done.wait [#allocation4], 128  }
 0x1b7   :  { %634 = vsyncadd [#allocation4], 4294967168 }
 0x1b8   :  { %552 = vsyncpa [#allocation3], 1 }
 0x1b9   :  { %553 = vsyncpa [#allocation4], 1 }

</bundles_post_ra>
